<compile_context>
chip_gen: v7x
topology: tpu7x:2x2x1
jax: 0.10.0
libtpu: 0.0.40
codegen_flags: <defaults>
</compile_context>

<pallas_src>
import functools

import jax
import jax.numpy as jnp
from jax.experimental import pallas as pl
from jax.experimental.pallas import tpu as pltpu


def _focal_loss_kernel(tile_n, tiles_per_split, n_ref, x_ref, t_ref, out_ref,
                       acc_ref):
    # n_ref:   (1,)        int32 scalar-prefetch (true batch size N) in SMEM
    # x_ref:   (tile_n, C) logits tile in VMEM (native dtype)
    # t_ref:   (tile_n, 1) int32 targets tile in VMEM
    # out_ref: (1, 1)      f32 per-split partial sum (leading split dim squeezed)
    # acc_ref: (tile_n, 1) f32 VMEM vector accumulator (persists across steps)
    s = pl.program_id(0)            # core-split axis ("parallel")
    i = pl.program_id(1)            # batch-tile axis within split ("arbitrary")

    @pl.when(i == 0)
    def _():
        acc_ref[...] = jnp.zeros_like(acc_ref)

    xn = x_ref[...]                 # native dtype (bf16 stays packed on v6e/v7x)
    t = t_ref[...]                  # (tile_n, 1) int32
    n_valid = n_ref[0]              # int32 scalar

    # Row max and target-logit gather on the native dtype (max/select of
    # representable values is exact); cast to f32 only for the exp/LSE path.
    m = jnp.max(xn, axis=-1, keepdims=True).astype(jnp.float32)      # (tile_n, 1)
    col = jax.lax.broadcasted_iota(jnp.int32, (1, xn.shape[-1]), 1)  # (1, C)
    tgt = jnp.sum(jnp.where(col == t, xn, jnp.zeros_like(xn)),
                  axis=-1, keepdims=True).astype(jnp.float32)        # (tile_n, 1)

    xf = xn.astype(jnp.float32)
    lse = m + jnp.log(jnp.sum(jnp.exp(xf - m), axis=-1, keepdims=True))
    nll = lse - tgt                                                  # (tile_n, 1)

    # Mask rows past the true batch size. Uses the *logical* global row index,
    # so clamped/duplicated overflow blocks from the core split contribute 0.
    global_tile = s * tiles_per_split + i
    row = jax.lax.broadcasted_iota(jnp.int32, nll.shape, 0) + global_tile * tile_n
    nll = jnp.where(row < n_valid, nll, 0.0)

    acc_ref[...] += nll             # vector accumulate; no per-step XLU reduce

    @pl.when(i == pl.num_programs(1) - 1)
    def _():
        # Single cross-sublane reduce per split -> (1, 1) partial sum.
        out_ref[...] = jnp.sum(acc_ref[...], keepdims=True)


def _pick_tile_n(n, c, itemsize, target_tile_bytes, vmem_budget_bytes,
                 num_buffers=2):
    """Batch-tile rows: ~target_tile_bytes per logits tile, double-buffer aware."""
    logits_row = c * itemsize
    row_bytes = logits_row + 4                     # + int32 target per row
    by_target = max(1, target_tile_bytes // logits_row)
    by_vmem = max(1, vmem_budget_bytes // (num_buffers * row_bytes))
    tile = min(n, by_target, by_vmem)
    if tile >= n:
        return n                                   # full batch: no divisibility constraint
    tile = (tile // 32) * 32                       # multiple of 32 covers f32/bf16/int8
    # Floor of 32 rows; vocab-scale C that overflows VMEM even at 32 rows needs
    # the class-axis tiling TODO above.
    return max(32, tile)


def focal_loss(inputs, targets, gamma=2.0, *,
               target_tile_bytes=4 * 1024 * 1024,
               vmem_budget_bytes=32 * 1024 * 1024,
               vmem_limit_bytes=48 * 1024 * 1024,
               num_core_splits=2):
    """inputs: (N, C) float logits (any float dtype); targets: (N,) int class ids."""
    n, c = inputs.shape
    tile_n = _pick_tile_n(n, c, inputs.dtype.itemsize, target_tile_bytes,
                          vmem_budget_bytes)
    num_tiles = pl.cdiv(n, tile_n)
    num_splits = max(1, min(num_core_splits, num_tiles))
    tiles_per_split = pl.cdiv(num_tiles, num_splits)

    t2 = targets.astype(jnp.int32).reshape(n, 1)
    n_arr = jnp.array([n], dtype=jnp.int32)

    def row_block(s, i, n_ref):
        # Clamp overflow tiles of the core split to the last real block; the
        # kernel masks them out by logical row index, so duplication is safe.
        return (jnp.minimum(s * tiles_per_split + i, num_tiles - 1), 0)

    kernel = functools.partial(_focal_loss_kernel, tile_n, tiles_per_split)
    partials = pl.pallas_call(
        kernel,
        out_shape=jax.ShapeDtypeStruct((num_splits, 1, 1), jnp.float32),
        grid_spec=pltpu.PrefetchScalarGridSpec(
            num_scalar_prefetch=1,
            grid=(num_splits, tiles_per_split),
            in_specs=[
                pl.BlockSpec((tile_n, c), row_block),
                pl.BlockSpec((tile_n, 1), row_block),
            ],
            out_specs=pl.BlockSpec((None, 1, 1), lambda s, i, n_ref: (s, 0, 0)),
            scratch_shapes=[pltpu.VMEM((tile_n, 1), jnp.float32)],
        ),
        compiler_params=pltpu.CompilerParams(
            dimension_semantics=("parallel", "arbitrary"),
            vmem_limit_bytes=vmem_limit_bytes,
        ),
    )(n_arr, inputs, t2)

    # Epilogue in the wrapper: sum per-core partials, mean, focal transform.
    total = jnp.sum(partials)
    ce = jnp.maximum(total / jnp.float32(n), 0.0)   # clamp fp-rounding negatives
    base = -jnp.expm1(-ce)                          # == 1 - exp(-ce), no cancellation
    return (base ** gamma) * ce


def _focal_loss_ref(inputs, targets, gamma=2.0):
    # Pure-JAX reference mirroring the PyTorch module.
    logp = jax.nn.log_softmax(inputs.astype(jnp.float32), axis=1)
    nll = -jnp.take_along_axis(logp, targets[:, None].astype(jnp.int32), axis=1)
    ce = jnp.mean(nll)
    p = jnp.exp(-ce)
    return (1.0 - p) ** gamma * ce


if __name__ == "__main__":
    key = jax.random.PRNGKey(0)
    k1, k2, k3, k4, k5, k6 = jax.random.split(key, 6)

    # Case 1: toy single-tile shape (grid (1,1)), f32 logits.
    N1, C1 = 8, 32
    x1 = jax.random.normal(k1, (N1, C1), dtype=jnp.float32)
    t1 = jax.random.randint(k2, (N1,), 0, C1, dtype=jnp.int32)
    out1 = jax.block_until_ready(focal_loss(x1, t1, gamma=2.0))
    ref1 = _focal_loss_ref(x1, t1, gamma=2.0)
    assert jnp.allclose(out1, ref1, rtol=1e-5, atol=1e-5), (out1, ref1)

    # Case 2: bf16 logits at native dtype, forced tiling (4 tiles over 2 splits),
    # masked partial tail tile (N % tile_n != 0).
    N2, C2 = 200, 128
    x2 = jax.random.normal(k3, (N2, C2), dtype=jnp.bfloat16)
    t2 = jax.random.randint(k4, (N2,), 0, C2, dtype=jnp.int32)
    out2 = jax.block_until_ready(
        focal_loss(x2, t2, gamma=2.0, target_tile_bytes=64 * C2 * 2))
    ref2 = _focal_loss_ref(x2, t2, gamma=2.0)
    assert jnp.allclose(out2, ref2, rtol=1e-4, atol=1e-4), (out2, ref2)

    # Case 3: odd tile count (3 tiles over 2 splits) -> exercises the clamped,
    # fully-masked overflow tile on the second split.
    N3, C3 = 200, 96
    x3 = jax.random.normal(k5, (N3, C3), dtype=jnp.float32)
    t3 = jax.random.randint(k6, (N3,), 0, C3, dtype=jnp.int32)
    out3 = jax.block_until_ready(
        focal_loss(x3, t3, gamma=2.0, target_tile_bytes=96 * C3 * 4))
    ref3 = _focal_loss_ref(x3, t3, gamma=2.0)
    assert jnp.allclose(out3, ref3, rtol=1e-5, atol=1e-5), (out3, ref3)

    print("KERNEL_OK")
</pallas_src>

<mosaic_0001>
module attributes {stable_mosaic.version = 11 : i64} {
  func.func @_focal_loss_kernel(%arg0: i32, %arg1: i32, %arg2: memref<1xi32, #tpu.memory_space<smem>>, %arg3: memref<8x32xf32, #tpu.memory_space<vmem>>, %arg4: memref<8x1xi32, #tpu.memory_space<vmem>>, %arg5: memref<1x1x1xf32, #tpu.memory_space<vmem>>, %arg6: memref<8x1xf32, #tpu.memory_space<vmem>>) attributes {dimension_semantics = [#tpu.dimension_semantics<parallel>, #tpu.dimension_semantics<arbitrary>], iteration_bounds = array<i64: 1, 1>, scalar_prefetch = 1 : i64, scratch_operands = 1 : i64, tpu.core_type = #tpu.core_type<tc>, window_params = [{transform_indices = @transform_0, window_bounds = array<i64: 8, 32>}, {transform_indices = @transform_1, window_bounds = array<i64: 8, 1>}, {transform_indices = @transform_2, window_bounds = array<i64: 1, 1, 1>}]} {
    %c0_i32 = arith.constant 0 : i32
    %0 = arith.cmpi eq, %arg1, %c0_i32 : i32
    %1 = arith.extui %0 : i1 to i32
    %c0_i32_0 = arith.constant 0 : i32
    %2 = arith.cmpi ne, %1, %c0_i32_0 : i32
    scf.if %2 {
      %cst_15 = arith.constant 0.000000e+00 : f32
      %40 = vector.broadcast %cst_15 : f32 to vector<8x1xf32>
      %c0_16 = arith.constant 0 : index
      %c0_17 = arith.constant 0 : index
      %41 = vector.load %arg6[%c0_16, %c0_17] : memref<8x1xf32, #tpu.memory_space<vmem>>, vector<8x1xf32>
      tpu.vector_store %arg6[%c0_16, %c0_17], %40 {strides = array<i32>} : memref<8x1xf32, #tpu.memory_space<vmem>>, vector<8x1xf32>,
    } else {
    }
    %c0 = arith.constant 0 : index
    %c0_1 = arith.constant 0 : index
    %3 = vector.load %arg3[%c0, %c0_1] : memref<8x32xf32, #tpu.memory_space<vmem>>, vector<8x32xf32>
    %c0_2 = arith.constant 0 : index
    %c0_3 = arith.constant 0 : index
    %4 = vector.load %arg4[%c0_2, %c0_3] : memref<8x1xi32, #tpu.memory_space<vmem>>, vector<8x1xi32>
    %c0_4 = arith.constant 0 : index
    %5 = memref.load %arg2[%c0_4] : memref<1xi32, #tpu.memory_space<smem>>
    %cst = arith.constant dense<0xFF800000> : vector<8xf32>
    %6 = vector.multi_reduction <maximumf>, %3, %cst [1] : vector<8x32xf32> to vector<8xf32>
    %7 = vector.shape_cast %6 : vector<8xf32> to vector<8x1xf32>
    %8 = tpu.iota {dimensions = array<i32: 1>} : vector<1x32xi32>
    %9 = vector.broadcast %8 : vector<1x32xi32> to vector<8x32xi32>
    %10 = vector.broadcast %4 : vector<8x1xi32> to vector<8x32xi32>
    %11 = arith.cmpi eq, %9, %10 : vector<8x32xi32>
    %cst_5 = arith.constant 0.000000e+00 : f32
    %12 = vector.broadcast %cst_5 : f32 to vector<8x32xf32>
    %13 = arith.select %11, %3, %12 : vector<8x32xi1>, vector<8x32xf32>
    %cst_6 = arith.constant dense<0.000000e+00> : vector<8xf32>
    %14 = vector.multi_reduction <add>, %13, %cst_6 [1] : vector<8x32xf32> to vector<8xf32>
    %15 = vector.shape_cast %14 : vector<8xf32> to vector<8x1xf32>
    %16 = vector.broadcast %7 : vector<8x1xf32> to vector<8x32xf32>
    %17 = arith.subf %3, %16 : vector<8x32xf32>
    %18 = math.exp %17 : vector<8x32xf32>
    %cst_7 = arith.constant dense<0.000000e+00> : vector<8xf32>
    %19 = vector.multi_reduction <add>, %18, %cst_7 [1] : vector<8x32xf32> to vector<8xf32>
    %20 = vector.shape_cast %19 : vector<8xf32> to vector<8x1xf32>
    %21 = math.log %20 : vector<8x1xf32>
    %22 = arith.addf %7, %21 : vector<8x1xf32>
    %23 = arith.subf %22, %15 : vector<8x1xf32>
    %c1_i32 = arith.constant 1 : i32
    %24 = arith.muli %arg0, %c1_i32 : i32
    %25 = arith.addi %24, %arg1 : i32
    %26 = tpu.iota {dimensions = array<i32: 0>} : vector<8x1xi32>
    %c8_i32 = arith.constant 8 : i32
    %27 = arith.muli %25, %c8_i32 : i32
    %28 = vector.broadcast %27 : i32 to vector<8x1xi32>
    %29 = arith.addi %26, %28 : vector<8x1xi32>
    %30 = vector.broadcast %5 : i32 to vector<8x1xi32>
    %31 = arith.cmpi slt, %29, %30 : vector<8x1xi32>
    %cst_8 = arith.constant 0.000000e+00 : f32
    %32 = vector.broadcast %cst_8 : f32 to vector<8x1xf32>
    %33 = arith.select %31, %23, %32 : vector<8x1xi1>, vector<8x1xf32>
    %c0_9 = arith.constant 0 : index
    %c0_10 = arith.constant 0 : index
    %34 = vector.load %arg6[%c0_9, %c0_10] : memref<8x1xf32, #tpu.memory_space<vmem>>, vector<8x1xf32>
    %35 = arith.addf %34, %33 : vector<8x1xf32>
    %c0_11 = arith.constant 0 : index
    %c0_12 = arith.constant 0 : index
    %36 = vector.load %arg6[%c0_11, %c0_12] : memref<8x1xf32, #tpu.memory_space<vmem>>, vector<8x1xf32>
    tpu.vector_store %arg6[%c0_11, %c0_12], %35 {strides = array<i32>} : memref<8x1xf32, #tpu.memory_space<vmem>>, vector<8x1xf32>,
    %c0_i32_13 = arith.constant 0 : i32
    %37 = arith.cmpi eq, %arg1, %c0_i32_13 : i32
    %38 = arith.extui %37 : i1 to i32
    %c0_i32_14 = arith.constant 0 : i32
    %39 = arith.cmpi ne, %38, %c0_i32_14 : i32
    scf.if %39 {
      %c0_15 = arith.constant 0 : index
      %c0_16 = arith.constant 0 : index
      %40 = vector.load %arg6[%c0_15, %c0_16] : memref<8x1xf32, #tpu.memory_space<vmem>>, vector<8x1xf32>
      %41 = vector.shape_cast %40 : vector<8x1xf32> to vector<1x8x1xf32>
      %cst_17 = arith.constant dense<0.000000e+00> : vector<1xf32>
      %42 = vector.multi_reduction <add>, %41, %cst_17 [1, 2] : vector<1x8x1xf32> to vector<1xf32>
      %43 = vector.shape_cast %42 : vector<1xf32> to vector<1x1x1xf32>
      %44 = vector.extract %43[0, 0, 0] : f32 from vector<1x1x1xf32>
      %45 = vector.broadcast %44 : f32 to vector<1x1xf32>
      %c0_18 = arith.constant 0 : index
      %c0_19 = arith.constant 0 : index
      %c0_20 = arith.constant 0 : index
      %46 = vector.load %arg5[%c0_18, %c0_19, %c0_20] : memref<1x1x1xf32, #tpu.memory_space<vmem>>, vector<1x1x1xf32>
      %47 = vector.shape_cast %46 : vector<1x1x1xf32> to vector<1x1xf32>
      %48 = vector.shape_cast %45 : vector<1x1xf32> to vector<1x1x1xf32>
      tpu.vector_store %arg5[%c0_18, %c0_19, %c0_20], %48 {strides = array<i32>} : memref<1x1x1xf32, #tpu.memory_space<vmem>>, vector<1x1x1xf32>,
    } else {
    }
    return
  }
  func.func @transform_0(%arg0: i32, %arg1: i32, %arg2: memref<1xi32, #tpu.memory_space<smem>>) -> (i32, i32) {
    %c1_i32 = arith.constant 1 : i32
    %0 = arith.muli %arg0, %c1_i32 : i32
    %1 = arith.addi %0, %arg1 : i32
    %c0_i32 = arith.constant 0 : i32
    %2 = arith.minsi %1, %c0_i32 : i32
    %c0_i32_0 = arith.constant 0 : i32
    %c0_i32_1 = arith.constant 0 : i32
    return %2, %c0_i32_0 : i32, i32
  }
  func.func @transform_1(%arg0: i32, %arg1: i32, %arg2: memref<1xi32, #tpu.memory_space<smem>>) -> (i32, i32) {
    %c1_i32 = arith.constant 1 : i32
    %0 = arith.muli %arg0, %c1_i32 : i32
    %1 = arith.addi %0, %arg1 : i32
    %c0_i32 = arith.constant 0 : i32
    %2 = arith.minsi %1, %c0_i32 : i32
    %c0_i32_0 = arith.constant 0 : i32
    %c0_i32_1 = arith.constant 0 : i32
    return %2, %c0_i32_0 : i32, i32
  }
  func.func @transform_2(%arg0: i32, %arg1: i32, %arg2: memref<1xi32, #tpu.memory_space<smem>>) -> (i32, i32, i32) {
    %c0_i32 = arith.constant 0 : i32
    %c0_i32_0 = arith.constant 0 : i32
    %c0_i32_1 = arith.constant 0 : i32
    return %arg0, %c0_i32, %c0_i32_0 : i32, i32, i32
  }
}

</mosaic_0001>

<bundles_post_ra>
// kernel: tpu_custom_call.1
= control target key start
LH: loop header
LB: loop body
LE: loop exit
PB: predicated region body
PF: predicated region fallthrough
CT: control target
= control target key end

     0   :  { %vm77_vm0 = vcmask 261120   ;;  %s241_s0 = inlined_call_operand.<no memory space> [shape: s32[1], index: 0, kind: input, shape index: {}]   ;;  %s242_s1 = inlined_call_operand.vmem [shape: f32[8,32], index: 1, kind: input, shape index: {}]   ;;  %s243_s2 = inlined_call_operand.vmem [shape: s32[8,1], index: 2, kind: input, shape index: {}]   ;;  %s244_s3 = inlined_call_operand.hbm [shape: f32[1,1,1], index: 3, kind: output, shape index: {}]  }
   0x1   :  { %v74_v0 = vld [vmem:[%s242_s1] sm:$0xff] }
   0x2   :  { %9 = vsyncpa [#allocation6], 0  ;;  %v78_v1 = vsel %vm77_vm0, %v74_v0, -inf  ;;  %v191_v2 = vmov 0   ;;  %v75_v3 = vld [vmem:[%s243_s2] sm:$0xff]  ;;  %v81_v7 = vlaneseq  ;;  %vm72_vm2 = vcmask 7168  }
   0x3   :  { %162 = vset.pattern.permute.xlu0 %v191_v2  ;;  %v192_v14 = vmov 0.0   ;;  %v107_v19 = vstv %s241_s0  ;;  %s193_s0 = smov [#allocation5]   ;;  %vm129_vm4 = vcmask 0  }
   0x4   :  { %79 = vmax.xlane.f32.xlu0 %v78_v1  ;;  %v82_v8 = vand.u32 127, %v81_v7  ;;  %73 = vst.msk [vmem:[#allocation2] sm:$0xff] %vm72_vm2, %v192_v14  ;;  %v103_v17 = vshrl.u32 %v81_v7, 7  ;;  %s137_s16 = sshll.u32 %s193_s0, 4  ;;  %s138_s16 = int_to_ptr.vmem [resolvable:$true] %s137_s16 }
   0x5   :  { %s167_s18 = scalar_lea.vmem %s138_s16, 16  ;;  %s171_s19 = scalar_lea.vmem %s138_s16, 32 }
   0x6   :  { %vm108_vm3 = vcmp.lt.s32.totalorder %v103_v17, %v107_v19  ;;  %p168_p0 = scmp.ne.s32.totalorder %s138_s16, %s167_s18  ;;  %p172_p1 = scmp.lt.s32.totalorder %s138_s16, %s138_s16 }
   0x7   :  { %p173_p2 = scmp.lt.s32.totalorder %s171_s19, %s167_s18 }
   0x9   :  { %p174_p3 = por %p173_p2, %p172_p1 }
   0xb   :  { %v110_v23 = vld [vmem:[#allocation2] sm:$0xff]  ;;  %p175_p4 = pnand %p174_p3, %p168_p0 }
  0x1a   :  { %84 = vperm.xlu0 %162, %v75_v3  }
  0x91   :  { %v80_v4 = vpop.xlane.xlu0 %79 }
  0x92   :  { %v91_v5 = vsub.f32 %v74_v0, %v80_v4 }
  0x94   :  { %v92_v6 = vmul.f32 1.442695, %v91_v5 }
  0x96   :  { %163 = vpow2.f32 %v92_v6 }
  0x99   :  { %v85_v9 = vpop.permute.xlu0 %84 }
  0x9a   :  { %vm86_vm1 = vcmp.eq.s32.totalorder %v82_v8, %v85_v9 }
  0x9b   :  { %v87_v11 = vsel %vm86_vm1, %v74_v0, 0.0 }
  0x9c   :  { %v88_v13 = vsel %vm77_vm0, %v87_v11, 0.0 }
  0xa0   :  { %v164_v10 = vpop.eup %163 }
  0xa1   :  { %v94_v12 = vsel %vm77_vm0, %v164_v10, 0.0 }
  0xa2   :  { %95 = vadd.xlane.f32.xlu1 %v94_v12 }
  0xa6   :  { %89 = vadd.xlane.f32.xlu1 %v88_v13 }
 0x12f   :  { %v96_v15 = vpop.xlane.xlu1 %95 }
 0x130   :  { %165 = vlog2.f32 %v96_v15 }
 0x133   :  { %v90_v20 = vpop.xlane.xlu1 %89 }
 0x13a   :  { %v166_v16 = vpop.eup %165 }
 0x13b   :  { %v98_v18 = vmul.f32 0.6931472, %v166_v16 }
 0x13d   :  { %v99_v21 = vadd.f32 %v98_v18, %v80_v4 }
 0x13f   :  { %v100_v22 = vsub.f32 %v99_v21, %v90_v20 }
 0x141   :  { %v109_v24 = vsel %vm108_vm3, %v100_v22, 0.0 }
 0x142   :  { %v111_v25 = vadd.f32 %v110_v23, %v109_v24 }
 0x144   :  { %113 = vst.msk [vmem:[#allocation2] sm:$0xff] %vm72_vm2, %v111_v25 }
 0x14b   :  { %v117_v26 = vld [vmem:[#allocation2] sm:$0xff] }
 0x14c   :  { %v118_v27 = vsel %vm72_vm2, %v117_v26, 0.0 }
 0x14d   :  { %119 = vadd.xlane.f32.xlu1 %v118_v27 }
 0x1da   :  { %v120_v28 = vpop.xlane.xlu1 %119 }
 0x1db   :  { %v121_v29 = vrot.slane %v120_v28, 4 }
 0x1dd   :  { %v122_v30 = vadd.f32 %v121_v29, %v120_v28 }
 0x1df   :  { %v123_v31 = vrot.slane %v122_v30, 2 }
 0x1e1   :  { %v124_v32 = vadd.f32 %v123_v31, %v122_v30 }
 0x1e3   :  { %v125_v33 = vrot.slane %v124_v32, 1 }
 0x1e5   :  { %v126_v34 = vadd.f32 %v125_v33, %v124_v32 }
 0x1e7   :  { %157 = vpush %v126_v34 }
 0x218   :  { %s158_s17 = spop %157 }
 0x219   :  { %v128_v35 = vstv %s158_s17 }
 0x21a   :  { %130 = vst.msk [vmem:[#allocation5] sm:$0x1] %vm129_vm4, %v128_v35 }
 0x21b   :  { %178 = shalt.err (!%p175_p4)
}
 0x21c   :  { %s179_s22 = scalar_lea.hbm %s244_s3, 16 }
 0x21d   :  { %p180_p5 = scmp.ne.s32.totalorder %s244_s3, %s179_s22  ;;  %p183_p6 = scmp.lt.u32.totalorder %s179_s22, %s244_s3 }
 0x21f   :  { %p185_p7 = pnand %p183_p6, %p180_p5 }
 0x221   :  { %188 = shalt.err (!%p185_p7)
}
 0x222   :  { %140 = dma.vmem_to_hbm [thread:$0]  %s138_s16, 16, %s244_s3, [#allocation6]  }
 0x223   :  { %189 = dma.done.wait [#allocation6], 16  }
 0x224   :  { %190 = vsyncadd [#allocation6], 4294967280 }
 0x225   :  { %144 = vsyncpa [#allocation6], 1 }

</bundles_post_ra>
